<compile_context>
chip_gen: v5e
topology: v5e:2x2
jax: 0.10.0
libtpu: 0.0.40
codegen_flags: <defaults>
</compile_context>

<pallas_src>
import math
import jax
import jax.numpy as jnp
from jax.experimental import pallas as pl
from jax.experimental.pallas import tpu as pltpu


# --------------------------------------------------------------------------- #
# parameter init (deterministic xavier-uniform weights, zero biases)           #
# --------------------------------------------------------------------------- #
def init_params(key, input_dim, embed_dim):
    # TODO(synk): torch nn.Linear uses kaiming-uniform + uniform bias init; exact
    # init values don't affect forward semantics, so deterministic xavier is used.
    k1, k2 = jax.random.split(key)

    def xavier(k, fan_in, fan_out):
        bound = math.sqrt(6.0 / (fan_in + fan_out))
        return jax.random.uniform(k, (fan_in, fan_out), jnp.float32, -bound, bound)

    return {
        "w1": xavier(k1, input_dim, embed_dim),        # (Din, E)
        "b1": jnp.zeros((embed_dim,), jnp.float32),    # (E,)
        "w2": xavier(k2, embed_dim, 1),                # (E, 1)
        "b2": jnp.zeros((1,), jnp.float32),            # (1,)
    }


# --------------------------------------------------------------------------- #
# Pallas kernel: fused attention-weight head                                   #
# --------------------------------------------------------------------------- #
def mil_kernel(xt_ref, gi_ref, w1t_ref, b1_ref, w2_ref, b2_ref, o_ref):
    # xt_ref : (1, Din, tL) bf16   -- x transposed, seq on lanes
    # gi_ref : (1, 1,  tL) f32     -- gene indicators (ones when None)
    # w1t_ref: (E, Din) f32, b1_ref: (E, 1), w2_ref: (E, 1), b2_ref: (1, 1)
    # o_ref  : (1, 1,  tL) f32
    xt = xt_ref[0]                                                  # (Din, tL) bf16
    w1t = w1t_ref[...].astype(jnp.bfloat16)                         # (E, Din)  bf16

    # Linear 1 on the MXU: bf16 x bf16 -> f32 accumulate
    h = jnp.dot(w1t, xt, preferred_element_type=jnp.float32)        # (E, tL) f32
    h = jnp.tanh(h + b1_ref[...])                                   # EUP tanh

    # Linear 2 has a single output unit: VPU multiply + sublane reduce
    s = jnp.sum(h * w2_ref[...], axis=0, keepdims=True) + b2_ref[...]   # (1, tL)

    # sigmoid with the divide on the (otherwise idle) EUP reciprocal slot
    w = pl.reciprocal(1.0 + jnp.exp(-s), approx=True)               # (1, tL)

    o_ref[0] = w * gi_ref[0]                                        # lane-dense store


# --------------------------------------------------------------------------- #
# wrapper: MIL.forward                                                         #
# --------------------------------------------------------------------------- #
def mil_forward(params, x, gene_indicators=None, *, seq_tile=None):
    """x: (B, L, input_dim) f32; gene_indicators: (B, L) or None -> (B, L) f32."""
    B, L, Din = x.shape
    E = params["w1"].shape[1]

    # Lane-dense layout: put the sequence axis last (lanes); cast to bf16 for the MXU.
    xt = jnp.transpose(x, (0, 2, 1)).astype(jnp.bfloat16)           # (B, Din, L)
    if gene_indicators is None:
        gi = jnp.ones((B, 1, L), jnp.float32)
    else:
        gi = gene_indicators.astype(jnp.float32).reshape(B, 1, L)

    w1t = params["w1"].T.astype(jnp.float32)                        # (E, Din)
    b1 = params["b1"].reshape(E, 1).astype(jnp.float32)
    w2 = params["w2"].reshape(E, 1).astype(jnp.float32)
    b2 = params["b2"].reshape(1, 1).astype(jnp.float32)

    # Sequence tiling: whole sequence for small / ragged L, 1024-lane tiles otherwise.
    if seq_tile is None:
        seq_tile = min(L, 1024) if (L % 128 == 0) else L
    n_l = pl.cdiv(L, seq_tile)

    out = pl.pallas_call(
        mil_kernel,
        out_shape=jax.ShapeDtypeStruct((B, 1, L), jnp.float32),
        grid_spec=pltpu.PrefetchScalarGridSpec(
            num_scalar_prefetch=0,
            grid=(B, n_l),
            in_specs=[
                pl.BlockSpec((1, Din, seq_tile), lambda b, l: (b, 0, l)),
                pl.BlockSpec((1, 1, seq_tile), lambda b, l: (b, 0, l)),
                pl.BlockSpec((E, Din), lambda b, l: (0, 0)),
                pl.BlockSpec((E, 1), lambda b, l: (0, 0)),
                pl.BlockSpec((E, 1), lambda b, l: (0, 0)),
                pl.BlockSpec((1, 1), lambda b, l: (0, 0)),
            ],
            out_specs=pl.BlockSpec((1, 1, seq_tile), lambda b, l: (b, 0, l)),
        ),
        compiler_params=pltpu.CompilerParams(
            dimension_semantics=("parallel", "parallel"),   # shards across v7x's 2 TCs
            vmem_limit_bytes=32 * 1024 * 1024,
        ),
    )(xt, gi, w1t, b1, w2, b2)

    return out.reshape(B, L)


# --------------------------------------------------------------------------- #
# pure-JAX reference (mirrors the torch math, full f32)                        #
# --------------------------------------------------------------------------- #
def ref_forward(params, x, gene_indicators=None):
    h = jnp.tanh(x @ params["w1"] + params["b1"])
    s = h @ params["w2"] + params["b2"]            # (B, L, 1)
    w = jax.nn.sigmoid(s)[..., 0]                  # squeeze(-1)
    if gene_indicators is not None:
        w = w * gene_indicators
    return w


if __name__ == "__main__":
    # small shapes consistent with the module
    B, L = 2, 8
    input_dim, embed_dim = 16, 32

    key = jax.random.PRNGKey(0)
    kp, kx, kg = jax.random.split(key, 3)

    params = init_params(kp, input_dim, embed_dim)
    x = jax.random.normal(kx, (B, L, input_dim), jnp.float32)
    gene_indicators = (jax.random.uniform(kg, (B, L)) > 0.3).astype(jnp.float32)

    out = mil_forward(params, x, gene_indicators)
    out = jax.block_until_ready(out)

    ref = ref_forward(params, x, gene_indicators)
    assert out.shape == (B, L)
    err = float(jnp.max(jnp.abs(out - ref)))
    assert jnp.allclose(out, ref, rtol=2e-2, atol=2e-2), f"max err {err}"

    # also exercise the gene_indicators=None path of the module
    out_none = jax.block_until_ready(mil_forward(params, x, None))
    ref_none = ref_forward(params, x, None)
    assert jnp.allclose(out_none, ref_none, rtol=2e-2, atol=2e-2)

    print("KERNEL_OK")
</pallas_src>

<mosaic_0001>
module attributes {stable_mosaic.version = 11 : i64} {
  func.func @mil_kernel(%arg0: i32, %arg1: i32, %arg2: memref<1x16x8xbf16, #tpu.memory_space<vmem>>, %arg3: memref<1x1x8xf32, #tpu.memory_space<vmem>>, %arg4: memref<32x16xf32, #tpu.memory_space<vmem>>, %arg5: memref<32x1xf32, #tpu.memory_space<vmem>>, %arg6: memref<32x1xf32, #tpu.memory_space<vmem>>, %arg7: memref<1x1xf32, #tpu.memory_space<vmem>>, %arg8: memref<1x1x8xf32, #tpu.memory_space<vmem>>) attributes {dimension_semantics = [#tpu.dimension_semantics<parallel>, #tpu.dimension_semantics<parallel>], iteration_bounds = array<i64: 2, 1>, scalar_prefetch = 0 : i64, scratch_operands = 0 : i64, tpu.core_type = #tpu.core_type<tc>, window_params = [{transform_indices = @transform_0, window_bounds = array<i64: 1, 16, 8>}, {transform_indices = @transform_1, window_bounds = array<i64: 1, 1, 8>}, {pipeline_mode = #tpu.pipeline_mode<synchronous>, transform_indices = @transform_2, window_bounds = array<i64: 32, 16>}, {pipeline_mode = #tpu.pipeline_mode<synchronous>, transform_indices = @transform_3, window_bounds = array<i64: 32, 1>}, {pipeline_mode = #tpu.pipeline_mode<synchronous>, transform_indices = @transform_4, window_bounds = array<i64: 32, 1>}, {pipeline_mode = #tpu.pipeline_mode<synchronous>, transform_indices = @transform_5, window_bounds = array<i64: 1, 1>}, {transform_indices = @transform_6, window_bounds = array<i64: 1, 1, 8>}]} {
    %c0 = arith.constant 0 : index
    %c0_0 = arith.constant 0 : index
    %c0_1 = arith.constant 0 : index
    %0 = vector.load %arg2[%c0, %c0_0, %c0_1] : memref<1x16x8xbf16, #tpu.memory_space<vmem>>, vector<1x16x8xbf16>
    %1 = vector.shape_cast %0 : vector<1x16x8xbf16> to vector<16x8xbf16>
    %c0_2 = arith.constant 0 : index
    %c0_3 = arith.constant 0 : index
    %2 = vector.load %arg4[%c0_2, %c0_3] : memref<32x16xf32, #tpu.memory_space<vmem>>, vector<32x16xf32>
    %3 = arith.truncf %2 : vector<32x16xf32> to vector<32x16xbf16>
    %cst = arith.constant dense<0.000000e+00> : vector<32x8xf32>
    %4 = tpu.matmul %3, %1, %cst {dimension_numbers = #tpu.dot_dimension_numbers<[1], [0], [0], [1], [0, 0, 1, 1], [], []>} : vector<32x16xbf16>, vector<16x8xbf16>, vector<32x8xf32> -> vector<32x8xf32>
    %c0_4 = arith.constant 0 : index
    %c0_5 = arith.constant 0 : index
    %5 = vector.load %arg5[%c0_4, %c0_5] : memref<32x1xf32, #tpu.memory_space<vmem>>, vector<32x1xf32>
    %6 = vector.broadcast %5 : vector<32x1xf32> to vector<32x8xf32>
    %7 = arith.addf %4, %6 : vector<32x8xf32>
    %8 = math.tanh %7 : vector<32x8xf32>
    %c0_6 = arith.constant 0 : index
    %c0_7 = arith.constant 0 : index
    %9 = vector.load %arg6[%c0_6, %c0_7] : memref<32x1xf32, #tpu.memory_space<vmem>>, vector<32x1xf32>
    %10 = vector.broadcast %9 : vector<32x1xf32> to vector<32x8xf32>
    %11 = arith.mulf %8, %10 : vector<32x8xf32>
    %cst_8 = arith.constant dense<0.000000e+00> : vector<8xf32>
    %12 = vector.multi_reduction <add>, %11, %cst_8 [0] : vector<32x8xf32> to vector<8xf32>
    %13 = vector.shape_cast %12 : vector<8xf32> to vector<1x8xf32>
    %c0_9 = arith.constant 0 : index
    %c0_10 = arith.constant 0 : index
    %14 = vector.load %arg7[%c0_9, %c0_10] : memref<1x1xf32, #tpu.memory_space<vmem>>, vector<1x1xf32>
    %15 = vector.broadcast %14 : vector<1x1xf32> to vector<1x8xf32>
    %16 = arith.addf %13, %15 : vector<1x8xf32>
    %cst_11 = arith.constant 0.000000e+00 : f32
    %17 = vector.broadcast %cst_11 : f32 to vector<1x8xf32>
    %18 = arith.subf %17, %16 : vector<1x8xf32>
    %19 = math.exp %18 : vector<1x8xf32>
    %cst_12 = arith.constant 1.000000e+00 : f32
    %20 = vector.broadcast %cst_12 : f32 to vector<1x8xf32>
    %21 = arith.addf %20, %19 : vector<1x8xf32>
    %22 = tpu.reciprocal %21 {approx = true} : vector<1x8xf32> -> vector<1x8xf32>
    %c0_13 = arith.constant 0 : index
    %c0_14 = arith.constant 0 : index
    %c0_15 = arith.constant 0 : index
    %23 = vector.load %arg3[%c0_13, %c0_14, %c0_15] : memref<1x1x8xf32, #tpu.memory_space<vmem>>, vector<1x1x8xf32>
    %24 = vector.shape_cast %23 : vector<1x1x8xf32> to vector<1x8xf32>
    %25 = arith.mulf %22, %24 : vector<1x8xf32>
    %c0_16 = arith.constant 0 : index
    %c0_17 = arith.constant 0 : index
    %c0_18 = arith.constant 0 : index
    %26 = vector.load %arg8[%c0_16, %c0_17, %c0_18] : memref<1x1x8xf32, #tpu.memory_space<vmem>>, vector<1x1x8xf32>
    %27 = vector.shape_cast %26 : vector<1x1x8xf32> to vector<1x8xf32>
    %28 = vector.shape_cast %25 : vector<1x8xf32> to vector<1x1x8xf32>
    tpu.vector_store %arg8[%c0_16, %c0_17, %c0_18], %28 {strides = array<i32>} : memref<1x1x8xf32, #tpu.memory_space<vmem>>, vector<1x1x8xf32>,
    return
  }
  func.func @transform_0(%arg0: i32, %arg1: i32) -> (i32, i32, i32) {
    %c0_i32 = arith.constant 0 : i32
    %c0_i32_0 = arith.constant 0 : i32
    return %arg0, %c0_i32, %arg1 : i32, i32, i32
  }
  func.func @transform_1(%arg0: i32, %arg1: i32) -> (i32, i32, i32) {
    %c0_i32 = arith.constant 0 : i32
    %c0_i32_0 = arith.constant 0 : i32
    return %arg0, %c0_i32, %arg1 : i32, i32, i32
  }
  func.func @transform_2(%arg0: i32, %arg1: i32) -> (i32, i32) {
    %c0_i32 = arith.constant 0 : i32
    %c0_i32_0 = arith.constant 0 : i32
    %c0_i32_1 = arith.constant 0 : i32
    return %c0_i32, %c0_i32_0 : i32, i32
  }
  func.func @transform_3(%arg0: i32, %arg1: i32) -> (i32, i32) {
    %c0_i32 = arith.constant 0 : i32
    %c0_i32_0 = arith.constant 0 : i32
    %c0_i32_1 = arith.constant 0 : i32
    return %c0_i32, %c0_i32_0 : i32, i32
  }
  func.func @transform_4(%arg0: i32, %arg1: i32) -> (i32, i32) {
    %c0_i32 = arith.constant 0 : i32
    %c0_i32_0 = arith.constant 0 : i32
    %c0_i32_1 = arith.constant 0 : i32
    return %c0_i32, %c0_i32_0 : i32, i32
  }
  func.func @transform_5(%arg0: i32, %arg1: i32) -> (i32, i32) {
    %c0_i32 = arith.constant 0 : i32
    %c0_i32_0 = arith.constant 0 : i32
    %c0_i32_1 = arith.constant 0 : i32
    return %c0_i32, %c0_i32_0 : i32, i32
  }
  func.func @transform_6(%arg0: i32, %arg1: i32) -> (i32, i32, i32) {
    %c0_i32 = arith.constant 0 : i32
    %c0_i32_0 = arith.constant 0 : i32
    return %arg0, %c0_i32, %arg1 : i32, i32, i32
  }
}

</mosaic_0001>

<bundles_post_ra>
// kernel: tpu_custom_call.1
= control target key start
LH: loop header
LB: loop body
LE: loop exit
PB: predicated region body
PF: predicated region fallthrough
CT: control target
= control target key end

     0   :  { %s873_s0 = inlined_call_operand.vmem [shape: bf16[2,16,8], index: 0, kind: input, shape index: {}]   ;;  %s874_s1 = inlined_call_operand.vmem [shape: f32[2,1,8], index: 1, kind: input, shape index: {}]   ;;  %s875_s2 = inlined_call_operand.vmem [shape: f32[32,16], index: 2, kind: input, shape index: {}]   ;;  %s876_s3 = inlined_call_operand.vmem [shape: f32[32,1], index: 3, kind: input, shape index: {}]   ;;  %s877_s4 = inlined_call_operand.vmem [shape: f32[32,1], index: 4, kind: input, shape index: {}]   ;;  %s878_s5 = inlined_call_operand.<no memory space> [shape: f32[1,1], index: 5, kind: input, shape index: {}]   ;;  %s879_s6 = inlined_call_operand.hbm [shape: f32[2,1,8], index: 6, kind: output, shape index: {}]  }
   0x1   :  { %v11_v0 = vstv %s878_s5 }
   0x2   :  { %12 = vst [vmem:[#allocation2] sm:$0x1] %v11_v0 }
   0x3   :  { %13 = vsyncpa [#allocation4], 0 }
   0x4   :  { %15 = vsyncpa [#allocation4 + $0x1], 0  ;;  %s733_s23 = smov 0   ;;  %s735_s24 = smov 0  }
   0x5   :  { %s737_s25 = smov 0   ;;  %s739_s26 = smov 0  }
   0x6   :  { %s741_s27 = smov 0   ;;  %s743_s28 = smov 0  }
   0x7 LB: > { %s525_s5 = sadd.s32 4294967295, %s692_s28   ;;  %s526_s29 = sadd.s32 4294967294, %s692_s28   ;;  %s692_s28 = sphi %s743_s28, %s21_s28   ;;  %s688_s27 = sphi %s741_s27, %s886_s27   ;;  %s684_s26 = sphi %s739_s26, %s885_s26   ;;  %s680_s25 = sphi %s737_s25, %s884_s25   ;;  %s676_s24 = sphi %s735_s24, %s883_s24   ;;  %s672_s23 = sphi %s733_s23, %s882_s23  }
   0x8   : > { %s33_s30 = sadd.s32 1, %s688_s27  ;;  %s182_s7 = sadd.s32 1, %s680_s25 }
   0x9   : > { %p35_p0 = scmp.ge.s32.totalorder %s33_s30, 2  ;;  %p192_p1 = scmp.ne.s32.totalorder %s680_s25, %s676_s24 }
   0xa   : > { %p193_p2 = scmp.eq.s32.totalorder %s525_s5, 1  ;;  %p198_p3 = scmp.ne.s32.totalorder %s676_s24, %s672_s23 }
   0xb   : > { %s888_s30 = smov (%p35_p0, %s33_s30), 0  ;;  %p199_p5 = scmp.eq.s32.totalorder %s526_s29, 1 }
   0xc   : > { %p773_p4 = por %p193_p2, %p192_p1  ;;  %s177_s9 = ssub.s32 %s688_s27, %s888_s30 }
   0xd   : > { %p529_p6 = scmp.ge.s32.totalorder %s692_s28, 1  ;;  %p180_p7 = scmp.eq.s32.totalorder %s177_s9, 0 }
   0xe   : > { %p780_p8 = por %p199_p5, %p198_p3  ;;  %p249_p9 = scmp.lt.s32.totalorder %s692_s28, 3 }
   0xf   : > { %s786_s11 = scalar_select %p180_p7, %s680_s25, %s182_s7  }
  0x10   : > { %p250_p10 = pnand %p529_p6, %p249_p9 }
  0x11   : > { %p287_p11 = scmp.lt.s32.totalorder (!%p250_p10), %s684_s26, 1  ;;  %s285_s12 = sand.u32 (!%p250_p10), 1, %s676_s24  }
  0x12   : > { %253 = sbr.rel (%p250_p10) target bundleno = 222 (0xde), region = 44  ;;  %s439_s19 = scalar_lea.hbm (!%p250_p10), %s879_s6, %s684_s26 }
  0x13   : > { %s286_s20 = scalar_lea.vmem (!%p250_p10), [#allocation3], %s285_s12  ;;  %s443_s5 = sshll.u32 (!%p250_p10), %s439_s19, 4  ;;  %s444_s5 = int_to_ptr.hbm [resolvable:$true] %s443_s5 }
  0x14   : > { %s441_s22 = sshll.u32 (!%p250_p10), %s286_s20, 4  ;;  %s628_s29 = sshra.s32 (!%p250_p10), %s444_s5, 4  ;;  %s442_s22 = int_to_ptr.vmem [resolvable:$true] %s441_s22  ;;  %s629_s29 = int_to_ptr.hbm [resolvable:$true] %s628_s29 }
  0x15   : > { %s634_s9 = scalar_lea.hbm (!%p250_p10), %s879_s6, 2  ;;  %p635_p1 = scmp.lt.s32.totalorder (!%p250_p10), %s629_s29, %s879_s6 }
  0x17   : > { %v310_v1 = vld [vmem:[%s876_s3] sm:$0xff]  ;;  %v312_v2 = vld [vmem:[%s876_s3 + $0x10] sm:$0xff]  ;;  %v694_v3 = vmov 0   ;;  %s796_s16 = scalar_select %p287_p11, %s684_s26, 1  ;;  %v305_v6 = vld [vmem:[%s875_s2 + $0x8] sm:$0xff]  ;;  %vm340_vm0 = vcmask 130048  }
  0x18   : > { %599 = vset.pattern.permute.xlu0 %v694_v3  ;;  %600 = vset.pattern.permute.xlu1 %v694_v3  ;;  %v304_v4 = vld [vmem:[%s875_s2] sm:$0xff]  ;;  %v306_v7 = vld [vmem:[%s875_s2 + $0x10] sm:$0xff]  ;;  %v307_v8 = vld [vmem:[%s875_s2 + $0x18] sm:$0xff]  ;;  %vm398_vm1 = vcmask 64512   ;;  %vm427_vm2 = vcmask 57344  }
  0x19   : > { %316 = vperm.xlu0 %599, %v310_v1   ;;  %326 = vperm.xlu1 %600, %v312_v2   ;;  %v370_v5 = vld [vmem:[%s877_s4] sm:$0xff]  ;;  %s540_s21 = sshll.u32 %s796_s16, 3  ;;  %v308_v10 = vpack.c.bf16 %v305_v6, %v304_v4  ;;  %v309_v11 = vpack.c.bf16 %v307_v8, %v306_v7  ;;  %v311_v12 = vld [vmem:[%s876_s3 + $0x8] sm:$0xff]  ;;  %v313_v13 = vld [vmem:[%s876_s3 + $0x18] sm:$0xff] }
  0x1a   : > { %601 = vset.pattern.permute.xlu2 %v694_v3  ;;  %s294_s15 = scalar_lea.vmem %s873_s0, %s540_s21  ;;  %v371_v14 = vld [vmem:[%s877_s4 + $0x8] sm:$0xff]  ;;  %v372_v15 = vld [vmem:[%s877_s4 + $0x10] sm:$0xff]  ;;  %v373_v16 = vld [vmem:[%s877_s4 + $0x18] sm:$0xff]  ;;  %s430_s21 = scalar_lea.sflag [#allocation4], %s285_s12 }
  0x1b   : > { %376 = vperm.xlu2 %601, %v370_v5   ;;  %v541_v9 = vld [vmem:[%s294_s15] sm:$0xff]  ;;  %s300_s15 = scalar_lea.vmem %s874_s1, %s796_s16  ;;  %s630_s16 = scalar_lea.hbm %s629_s29, 1 }
  0x1c   : > { %354 = vmatpush.bf16.msra.mxu0 %v541_v9  ;;  %542 = vmatpush.bf16.msra.mxu1 %v541_v9  ;;  %v412_v17 = vld [vmem:[#allocation2] sm:$0x1]  ;;  %p631_p12 = scmp.ne.s32.totalorder %s629_s29, %s630_s16  ;;  %p636_p2 = scmp.lt.s32.totalorder %s634_s9, %s630_s16 }
  0x1d   : > { %v425_v62 = vld [vmem:[%s300_s15] sm:$0x1] }
  0x1e   : > { %p632_p13 = pnand %p631_p12, %p773_p4  ;;  %p637_p3 = por %p636_p2, %p635_p1 }
  0x1f   : > { %536 = vmatmul.msk.bf16.vlgmr.msra.gmra.mxu0 %vm340_vm0, %v308_v10  ;;  %537 = vmatmul.msk.bf16.vlgmr.msra.gmra.mxu1 %vm340_vm0, %v309_v11 }
  0x20   : > { %p633_p0 = pneg %p632_p13 }
  0x21   : > { %321 = vperm.xlu0 %599, %v311_v12   ;;  %331 = vperm.xlu1 %600, %v313_v13  }
  0x22   : > { %p638_p5 = pnand %p637_p3, %p633_p0 }
  0x23   : > { %381 = vperm.xlu2 %601, %v371_v14  }
  0x29   : > { %386 = vperm.xlu0 %599, %v372_v15   ;;  %391 = vperm.xlu1 %600, %v373_v16  }
  0x2b   : > { %415 = vperm.xlu2 %601, %v412_v17  }
  0x75   : > { %v377_v24 = vpop.permute.xlu2 %376 }
  0x7d   : > { %v382_v36 = vpop.permute.xlu2 %381 }
  0x85   : > { %v416_v53 = vpop.permute.xlu2 %415 }
  0x86   : > { %v418_v56 = vperm.slane %v416_v53, 0 }
  0x8b   : > { %v317_v18 = vpop.permute.xlu0 %316  ;;  %v327_v19 = vpop.permute.xlu1 %326 }
  0x93   : > { %v322_v25 = vpop.permute.xlu0 %321  ;;  %v332_v26 = vpop.permute.xlu1 %331 }
  0x9b   : > { %v387_v35 = vpop.permute.xlu0 %386  ;;  %v392_v40 = vpop.permute.xlu1 %391 }
  0x9c   : > { %v356_v20 = vpop.f32.mrf.mxu0  ;;  %v361_v21 = vpop.f32.mrf.mxu1 }
  0x9d   : > { %v357_v22 = vadd.f32 %v356_v20, %v317_v18  ;;  %v362_v23 = vadd.f32 %v361_v21, %v327_v19 }
  0x9f   : > { %602 = vtanh.f32 %v357_v22 }
  0xa0   : > { %604 = vtanh.f32 %v362_v23 }
  0xa4   : > { %v358_v27 = vpop.f32.mrf.mxu0  ;;  %v363_v28 = vpop.f32.mrf.mxu1 }
  0xa5   : > { %v359_v29 = vadd.f32 %v358_v27, %v322_v25  ;;  %v364_v30 = vadd.f32 %v363_v28, %v332_v26  ;;  %v603_v31 = vpop.eup %602 }
  0xa6   : > { %v605_v32 = vpop.eup %604  ;;  %v394_v33 = vmul.f32 %v603_v31, %v377_v24 }
  0xa7   : > { %606 = vtanh.f32 %v359_v29  ;;  %v396_v38 = vmul.f32 %v605_v32, %v387_v35 }
  0xa8   : > { %608 = vtanh.f32 %v364_v30  ;;  %v399_v41 = vsel %vm398_vm1, %v394_v33, 0.0 }
  0xa9   : > { %v402_v45 = vsel %vm398_vm1, %v396_v38, 0.0 }
  0xad   : > { %v607_v34 = vpop.eup %606 }
  0xae   : > { %v609_v37 = vpop.eup %608  ;;  %v395_v39 = vmul.f32 %v607_v34, %v382_v36 }
  0xaf   : > { %v397_v43 = vmul.f32 %v609_v37, %v392_v40 }
  0xb0   : > { %v400_v42 = vsel %vm398_vm1, %v395_v39, 0.0 }
  0xb1   : > { %v401_v44 = vadd.f32 %v400_v42, %v399_v41  ;;  %v404_v47 = vsel %vm398_vm1, %v397_v43, 0.0 }
  0xb3   : > { %v403_v46 = vadd.f32 %v402_v45, %v401_v44 }
  0xb5   : > { %v405_v48 = vadd.f32 %v404_v47, %v403_v46 }
  0xb7   : > { %v406_v49 = vrot.slane %v405_v48, 4 }
  0xb9   : > { %v407_v50 = vadd.f32 %v406_v49, %v405_v48 }
  0xbb   : > { %v408_v51 = vrot.slane %v407_v50, 2 }
  0xbd   : > { %v409_v52 = vadd.f32 %v408_v51, %v407_v50 }
  0xbf   : > { %v410_v54 = vrot.slane %v409_v52, 1 }
  0xc1   : > { %v411_v55 = vadd.f32 %v410_v54, %v409_v52 }
  0xc3   : > { %v419_v57 = vadd.f32 %v418_v56, %v411_v55 }
  0xc5   : > { %v420_v58 = vsub.f32 0.0, %v419_v57 }
  0xc7   : > { %v421_v59 = vmul.f32 1.442695, %v420_v58 }
  0xc9   : > { %610 = vpow2.f32 %v421_v59 }
  0xcf   : > { %v611_v60 = vpop.eup %610 }
  0xd0   : > { %v423_v61 = vadd.f32 1.0, %v611_v60 }
  0xd2   : > { %612 = vrcp.f32 %v423_v61 }
  0xd8   : > { %v613_v63 = vpop.eup %612 }
  0xd9   : > { %v426_v0 = vmul.f32 %v613_v63, %v425_v62 }
  0xdb   : > { %428 = vst.msk [vmem:[%s286_s20] sm:$0x1] %vm427_vm2, %v426_v0 }
  0xdc   : > { %641 = shalt.err (!%p638_p5)
}
  0xdd   : > { %543 = dma.vmem_to_hbm [thread:$0]  (%p773_p4), %s442_s22, 16, %s444_s5, %s430_s21  }
  0xde PF: > { %p549_p6 = scmp.ge.s32.totalorder %s692_s28, 2  ;;  %s455_s12 = sand.u32 1, %s672_s23  }
  0xdf   : > { %s456_s15 = scalar_lea.sflag [#allocation4], %s455_s12 }
  0xe0   : > { %p546_p7 = pnand %p549_p6, %p780_p8 }
  0xe2   : > { %p547_p9 = pneg %p546_p7 }
  0xe4   : > { %667 = dma.done.wait (%p547_p9), %s456_s15, 16  }
  0xe5   : > { %669 = vsyncadd (%p547_p9), %s456_s15, 4294967280  ;;  %s21_s28 = sadd.s32 1, %s692_s28   ;;  %s882_s23 = smov %s676_s24 }
  0xe6   : > { %p18_p10 = scmp.ge.s32.totalorder %s21_s28, 4   ;;  %s883_s24 = smov %s680_s25 }
  0xe7   : > { %s884_s25 = smov %s786_s11  ;;  %s885_s26 = smov %s688_s27 }
  0xe8   : > { %s886_s27 = smov %s888_s30  ;;  %20 = sbr.rel (!%p18_p10) target bundleno = 7 (0x7), region = 82 }
  0xed   :  { %461 = vsyncpa [#allocation4], 1 }
  0xee   :  { %463 = vsyncpa [#allocation4 + $0x1], 1 }

</bundles_post_ra>
